<compile_context>
chip_gen: v5e
topology: v5e:2x2
jax: 0.10.0
libtpu: 0.0.40
codegen_flags: <defaults>
</compile_context>

<pallas_src>
import jax
import jax.numpy as jnp
from jax import lax
from jax.experimental import pallas as pl
from jax.experimental.pallas import tpu as pltpu

# ---- module hyper-parameters (dim = heads * dim_head) ----
DIM = 32
HEADS = 4
DIM_HEAD = 8
LN_EPS = 1e-5


def make_mha_kernel(bblk: int, n: int):
    """Build a kernel closed over the static block sizes."""

    def mha_kernel(x_ref, wqkv_ref, bqkv_ref, out_ref):
        # x_ref: (bblk*n, D) f32 -- rows = batch*tokens (flattened in wrapper).
        x2 = x_ref[...]

        # ---- LayerNorm over last dim (affine already folded into wqkv/bqkv) ----
        mean = jnp.mean(x2, axis=-1, keepdims=True)
        var = jnp.mean((x2 - mean) ** 2, axis=-1, keepdims=True)
        xn = (x2 - mean) * lax.rsqrt(var + LN_EPS)                    # (bblk*n, D)

        # ---- fused Q|K|V projection: one MXU matmul (bf16 in, f32 acc) ----
        # (LN affine + 1/sqrt(dim_head) are folded into wqkv/bqkv on the host.)
        qkv = jnp.dot(xn.astype(jnp.bfloat16), wqkv_ref[...],
                      preferred_element_type=jnp.float32)
        qkv = qkv + bqkv_ref[...]                                     # (bblk*n, 3D)
        qkv3 = qkv.reshape(bblk, n, 3 * DIM)   # n==8: sublane-aligned split, cheap

        head_outs = []
        for h in range(HEADS):                                        # static, small
            qlo = h * DIM_HEAD
            klo = DIM + h * DIM_HEAD
            vlo = 2 * DIM + h * DIM_HEAD
            qh = qkv3[:, :, qlo:qlo + DIM_HEAD].astype(jnp.bfloat16)  # (bblk, n, dh)
            kh = qkv3[:, :, klo:klo + DIM_HEAD].astype(jnp.bfloat16)
            vh = qkv3[:, :, vlo:vlo + DIM_HEAD].astype(jnp.bfloat16)

            # batched over the batch block; no explicit K transpose
            s = jnp.einsum('bqd,bkd->bqk', qh, kh,
                           preferred_element_type=jnp.float32)        # (bblk, n, n)
            s = s - jnp.max(s, axis=-1, keepdims=True)
            p = jnp.exp(s)
            denom = jnp.sum(p, axis=-1, keepdims=True)
            # unnormalized PV matmul; normalize the small (n, dh) tile (EUP recip)
            oh = jnp.einsum('bqk,bkd->bqd', p.astype(jnp.bfloat16), vh,
                            preferred_element_type=jnp.float32)       # (bblk, n, dh)
            head_outs.append(oh * pl.reciprocal(denom, approx=True))

        # 'b h n d -> b n (h d)': heads concatenated along lanes; single store
        out_ref[...] = jnp.concatenate(head_outs, axis=-1)            # (bblk, n, D)

    return mha_kernel


def multi_head_attention(x, gamma, beta, wq, bq, wk, bk, wv, bv):
    """x: (B, N, D) float32. Weights pre-transposed to (D_in, D_out)."""
    B, N, D = x.shape
    assert D == DIM and D == HEADS * DIM_HEAD

    # ---- host-side weight prep (exact in f32, done once) ----
    scale = 1.0 / jnp.sqrt(jnp.float32(DIM_HEAD))
    wqkv = jnp.concatenate([wq * scale, wk, wv], axis=1)              # (D, 3D)
    bqkv = jnp.concatenate([bq * scale, bk, bv], axis=0)              # (3D,)
    # fold LayerNorm affine: (xn*gamma + beta) @ W + b
    #   == xn @ (gamma[:, None] * W) + (beta @ W + b)
    bqkv = (beta @ wqkv + bqkv).reshape(1, 3 * D).astype(jnp.float32)
    wqkv = (gamma[:, None] * wqkv).astype(jnp.bfloat16)               # bf16 MXU operand

    # Megacore split only when each core gets enough fused-QKV rows and the
    # per-core block stays sublane-aligned; v5e/v6e are single-TC, and at
    # small sizes extra grid steps are pure per-step (~0.35 us) overhead.
    half = B // 2
    G = 2 if (B % 2 == 0 and half % 8 == 0 and half * N >= 128) else 1
    Bblk = B // G

    x_flat = x.reshape(B * N, D)                                      # free, XLA-side

    return pl.pallas_call(
        make_mha_kernel(Bblk, N),
        out_shape=jax.ShapeDtypeStruct((B, N, D), jnp.float32),
        grid_spec=pltpu.PrefetchScalarGridSpec(
            num_scalar_prefetch=0,
            grid=(G,),
            in_specs=[
                pl.BlockSpec((Bblk * N, D), lambda g: (g, 0)),        # x rows
                pl.BlockSpec((D, 3 * D), lambda g: (0, 0)),           # fused W_qkv (bf16)
                pl.BlockSpec((1, 3 * D), lambda g: (0, 0)),           # fused b_qkv
            ],
            out_specs=pl.BlockSpec((Bblk, N, D), lambda g: (g, 0, 0)),
        ),
        compiler_params=pltpu.CompilerParams(
            dimension_semantics=("parallel",)),
    )(x_flat, wqkv, bqkv)


def reference(x, gamma, beta, wq, bq, wk, bk, wv, bv):
    """Plain-JAX reference mirroring the PyTorch forward."""
    mean = jnp.mean(x, axis=-1, keepdims=True)
    var = jnp.mean((x - mean) ** 2, axis=-1, keepdims=True)
    xn = (x - mean) / jnp.sqrt(var + LN_EPS) * gamma + beta
    q = xn @ wq + bq
    k = xn @ wk + bk
    v = xn @ wv + bv
    B, N, D = x.shape
    q = q.reshape(B, N, HEADS, DIM_HEAD).transpose(0, 2, 1, 3)
    k = k.reshape(B, N, HEADS, DIM_HEAD).transpose(0, 2, 1, 3)
    v = v.reshape(B, N, HEADS, DIM_HEAD).transpose(0, 2, 1, 3)
    att = jax.nn.softmax(q @ k.transpose(0, 1, 3, 2) / jnp.sqrt(jnp.float32(DIM_HEAD)),
                         axis=-1) @ v
    return att.transpose(0, 2, 1, 3).reshape(B, N, D)


if __name__ == "__main__":
    B, N = 2, 8
    key = jax.random.PRNGKey(0)
    ks = jax.random.split(key, 9)

    x = jax.random.normal(ks[0], (B, N, DIM), dtype=jnp.float32)
    # LayerNorm affine params
    gamma = 1.0 + 0.1 * jax.random.normal(ks[1], (DIM,), dtype=jnp.float32)
    beta = 0.1 * jax.random.normal(ks[2], (DIM,), dtype=jnp.float32)
    # Linear weights stored as (D_in, D_out) == torch W.T
    wq = jax.random.normal(ks[3], (DIM, DIM), dtype=jnp.float32) / jnp.sqrt(DIM)
    wk = jax.random.normal(ks[4], (DIM, DIM), dtype=jnp.float32) / jnp.sqrt(DIM)
    wv = jax.random.normal(ks[5], (DIM, DIM), dtype=jnp.float32) / jnp.sqrt(DIM)
    bq = 0.1 * jax.random.normal(ks[6], (DIM,), dtype=jnp.float32)
    bk = 0.1 * jax.random.normal(ks[7], (DIM,), dtype=jnp.float32)
    bv = 0.1 * jax.random.normal(ks[8], (DIM,), dtype=jnp.float32)

    out = multi_head_attention(x, gamma, beta, wq, bq, wk, bk, wv, bv)
    out = jax.block_until_ready(out)

    ref = reference(x, gamma, beta, wq, bq, wk, bk, wv, bv)
    assert out.shape == (B, N, DIM)
    # bf16 MXU operands (+ approx EUP reciprocal) introduce ~1e-2-level abs
    # error vs the f32 reference; tolerance relaxed accordingly.
    assert jnp.allclose(out, ref, atol=3e-2, rtol=3e-2), (
        "mismatch vs reference: max|diff|="
        + str(float(jnp.max(jnp.abs(out - ref)))))

    print("KERNEL_OK")
</pallas_src>

<mosaic_0001>
module attributes {stable_mosaic.version = 11 : i64} {
  func.func @mha_kernel(%arg0: i32, %arg1: memref<16x32xf32, #tpu.memory_space<vmem>>, %arg2: memref<32x96xbf16, #tpu.memory_space<vmem>>, %arg3: memref<1x96xf32, #tpu.memory_space<vmem>>, %arg4: memref<2x8x32xf32, #tpu.memory_space<vmem>>) attributes {dimension_semantics = [#tpu.dimension_semantics<parallel>], iteration_bounds = array<i64: 1>, scalar_prefetch = 0 : i64, scratch_operands = 0 : i64, tpu.core_type = #tpu.core_type<tc>, window_params = [{transform_indices = @transform_0, window_bounds = array<i64: 16, 32>}, {pipeline_mode = #tpu.pipeline_mode<synchronous>, transform_indices = @transform_1, window_bounds = array<i64: 32, 96>}, {pipeline_mode = #tpu.pipeline_mode<synchronous>, transform_indices = @transform_2, window_bounds = array<i64: 1, 96>}, {transform_indices = @transform_3, window_bounds = array<i64: 2, 8, 32>}]} {
    %c0 = arith.constant 0 : index
    %c0_0 = arith.constant 0 : index
    %0 = vector.load %arg1[%c0, %c0_0] : memref<16x32xf32, #tpu.memory_space<vmem>>, vector<16x32xf32>
    %cst = arith.constant dense<0.000000e+00> : vector<16xf32>
    %1 = vector.multi_reduction <add>, %0, %cst [1] : vector<16x32xf32> to vector<16xf32>
    %2 = vector.shape_cast %1 : vector<16xf32> to vector<16x1xf32>
    %cst_1 = arith.constant 3.200000e+01 : f32
    %3 = vector.broadcast %cst_1 : f32 to vector<16x1xf32>
    %4 = arith.divf %2, %3 : vector<16x1xf32>
    %5 = vector.broadcast %4 : vector<16x1xf32> to vector<16x32xf32>
    %6 = arith.subf %0, %5 : vector<16x32xf32>
    %7 = arith.mulf %6, %6 : vector<16x32xf32>
    %cst_2 = arith.constant dense<0.000000e+00> : vector<16xf32>
    %8 = vector.multi_reduction <add>, %7, %cst_2 [1] : vector<16x32xf32> to vector<16xf32>
    %9 = vector.shape_cast %8 : vector<16xf32> to vector<16x1xf32>
    %cst_3 = arith.constant 3.200000e+01 : f32
    %10 = vector.broadcast %cst_3 : f32 to vector<16x1xf32>
    %11 = arith.divf %9, %10 : vector<16x1xf32>
    %12 = vector.broadcast %4 : vector<16x1xf32> to vector<16x32xf32>
    %13 = arith.subf %0, %12 : vector<16x32xf32>
    %cst_4 = arith.constant 9.99999974E-6 : f32
    %14 = vector.broadcast %cst_4 : f32 to vector<16x1xf32>
    %15 = arith.addf %11, %14 : vector<16x1xf32>
    %16 = math.rsqrt %15 : vector<16x1xf32>
    %17 = vector.broadcast %16 : vector<16x1xf32> to vector<16x32xf32>
    %18 = arith.mulf %13, %17 : vector<16x32xf32>
    %19 = arith.truncf %18 : vector<16x32xf32> to vector<16x32xbf16>
    %c0_5 = arith.constant 0 : index
    %c0_6 = arith.constant 0 : index
    %20 = vector.load %arg2[%c0_5, %c0_6] : memref<32x96xbf16, #tpu.memory_space<vmem>>, vector<32x96xbf16>
    %cst_7 = arith.constant dense<0.000000e+00> : vector<16x96xf32>
    %21 = tpu.matmul %19, %20, %cst_7 {dimension_numbers = #tpu.dot_dimension_numbers<[1], [0], [0], [1], [0, 0, 1, 1], [], []>} : vector<16x32xbf16>, vector<32x96xbf16>, vector<16x96xf32> -> vector<16x96xf32>
    %c0_8 = arith.constant 0 : index
    %c0_9 = arith.constant 0 : index
    %22 = vector.load %arg3[%c0_8, %c0_9] : memref<1x96xf32, #tpu.memory_space<vmem>>, vector<1x96xf32>
    %23 = vector.broadcast %22 : vector<1x96xf32> to vector<16x96xf32>
    %24 = arith.addf %21, %23 : vector<16x96xf32>
    %25 = vector.shape_cast %24 : vector<16x96xf32> to vector<2x8x96xf32>
    %26 = vector.extract_strided_slice %25 {offsets = [0, 0, 0], sizes = [2, 8, 8], strides = [1, 1, 1]} : vector<2x8x96xf32> to vector<2x8x8xf32>
    %27 = arith.truncf %26 : vector<2x8x8xf32> to vector<2x8x8xbf16>
    %28 = vector.extract_strided_slice %25 {offsets = [0, 0, 32], sizes = [2, 8, 8], strides = [1, 1, 1]} : vector<2x8x96xf32> to vector<2x8x8xf32>
    %29 = arith.truncf %28 : vector<2x8x8xf32> to vector<2x8x8xbf16>
    %30 = vector.extract_strided_slice %25 {offsets = [0, 0, 64], sizes = [2, 8, 8], strides = [1, 1, 1]} : vector<2x8x96xf32> to vector<2x8x8xf32>
    %31 = arith.truncf %30 : vector<2x8x8xf32> to vector<2x8x8xbf16>
    "tpu.trace_start"() <{level = 10 : i32, message = "bqd,bkd->bqk"}> : () -> ()
    %cst_10 = arith.constant dense<0.000000e+00> : vector<2x8x8xf32>
    %32 = tpu.matmul %27, %29, %cst_10 {dimension_numbers = #tpu.dot_dimension_numbers<[2], [2], [1], [1], [0, 0, 0, 1, 1, 1], [0], [0]>} : vector<2x8x8xbf16>, vector<2x8x8xbf16>, vector<2x8x8xf32> -> vector<2x8x8xf32>
    "tpu.trace_stop"() : () -> ()
    %cst_11 = arith.constant dense<0xFF800000> : vector<2x8xf32>
    %33 = vector.multi_reduction <maximumf>, %32, %cst_11 [2] : vector<2x8x8xf32> to vector<2x8xf32>
    %34 = vector.shape_cast %33 : vector<2x8xf32> to vector<2x8x1xf32>
    %35 = vector.broadcast %34 : vector<2x8x1xf32> to vector<2x8x8xf32>
    %36 = arith.subf %32, %35 : vector<2x8x8xf32>
    %37 = math.exp %36 : vector<2x8x8xf32>
    %cst_12 = arith.constant dense<0.000000e+00> : vector<2x8xf32>
    %38 = vector.multi_reduction <add>, %37, %cst_12 [2] : vector<2x8x8xf32> to vector<2x8xf32>
    %39 = vector.shape_cast %38 : vector<2x8xf32> to vector<2x8x1xf32>
    %40 = arith.truncf %37 : vector<2x8x8xf32> to vector<2x8x8xbf16>
    "tpu.trace_start"() <{level = 10 : i32, message = "bqk,bkd->bqd"}> : () -> ()
    %cst_13 = arith.constant dense<0.000000e+00> : vector<2x8x8xf32>
    %41 = tpu.matmul %40, %31, %cst_13 {dimension_numbers = #tpu.dot_dimension_numbers<[2], [1], [1], [2], [0, 0, 0, 1, 1, 2], [0], [0]>} : vector<2x8x8xbf16>, vector<2x8x8xbf16>, vector<2x8x8xf32> -> vector<2x8x8xf32>
    "tpu.trace_stop"() : () -> ()
    %42 = tpu.reciprocal %39 {approx = true} : vector<2x8x1xf32> -> vector<2x8x1xf32>
    %43 = vector.broadcast %42 : vector<2x8x1xf32> to vector<2x8x8xf32>
    %44 = arith.mulf %41, %43 : vector<2x8x8xf32>
    %45 = vector.extract_strided_slice %25 {offsets = [0, 0, 8], sizes = [2, 8, 8], strides = [1, 1, 1]} : vector<2x8x96xf32> to vector<2x8x8xf32>
    %46 = arith.truncf %45 : vector<2x8x8xf32> to vector<2x8x8xbf16>
    %47 = vector.extract_strided_slice %25 {offsets = [0, 0, 40], sizes = [2, 8, 8], strides = [1, 1, 1]} : vector<2x8x96xf32> to vector<2x8x8xf32>
    %48 = arith.truncf %47 : vector<2x8x8xf32> to vector<2x8x8xbf16>
    %49 = vector.extract_strided_slice %25 {offsets = [0, 0, 72], sizes = [2, 8, 8], strides = [1, 1, 1]} : vector<2x8x96xf32> to vector<2x8x8xf32>
    %50 = arith.truncf %49 : vector<2x8x8xf32> to vector<2x8x8xbf16>
    "tpu.trace_start"() <{level = 10 : i32, message = "bqd,bkd->bqk"}> : () -> ()
    %cst_14 = arith.constant dense<0.000000e+00> : vector<2x8x8xf32>
    %51 = tpu.matmul %46, %48, %cst_14 {dimension_numbers = #tpu.dot_dimension_numbers<[2], [2], [1], [1], [0, 0, 0, 1, 1, 1], [0], [0]>} : vector<2x8x8xbf16>, vector<2x8x8xbf16>, vector<2x8x8xf32> -> vector<2x8x8xf32>
    "tpu.trace_stop"() : () -> ()
    %cst_15 = arith.constant dense<0xFF800000> : vector<2x8xf32>
    %52 = vector.multi_reduction <maximumf>, %51, %cst_15 [2] : vector<2x8x8xf32> to vector<2x8xf32>
    %53 = vector.shape_cast %52 : vector<2x8xf32> to vector<2x8x1xf32>
    %54 = vector.broadcast %53 : vector<2x8x1xf32> to vector<2x8x8xf32>
    %55 = arith.subf %51, %54 : vector<2x8x8xf32>
    %56 = math.exp %55 : vector<2x8x8xf32>
    %cst_16 = arith.constant dense<0.000000e+00> : vector<2x8xf32>
    %57 = vector.multi_reduction <add>, %56, %cst_16 [2] : vector<2x8x8xf32> to vector<2x8xf32>
    %58 = vector.shape_cast %57 : vector<2x8xf32> to vector<2x8x1xf32>
    %59 = arith.truncf %56 : vector<2x8x8xf32> to vector<2x8x8xbf16>
    "tpu.trace_start"() <{level = 10 : i32, message = "bqk,bkd->bqd"}> : () -> ()
    %cst_17 = arith.constant dense<0.000000e+00> : vector<2x8x8xf32>
    %60 = tpu.matmul %59, %50, %cst_17 {dimension_numbers = #tpu.dot_dimension_numbers<[2], [1], [1], [2], [0, 0, 0, 1, 1, 2], [0], [0]>} : vector<2x8x8xbf16>, vector<2x8x8xbf16>, vector<2x8x8xf32> -> vector<2x8x8xf32>
    "tpu.trace_stop"() : () -> ()
    %61 = tpu.reciprocal %58 {approx = true} : vector<2x8x1xf32> -> vector<2x8x1xf32>
    %62 = vector.broadcast %61 : vector<2x8x1xf32> to vector<2x8x8xf32>
    %63 = arith.mulf %60, %62 : vector<2x8x8xf32>
    %64 = vector.extract_strided_slice %25 {offsets = [0, 0, 16], sizes = [2, 8, 8], strides = [1, 1, 1]} : vector<2x8x96xf32> to vector<2x8x8xf32>
    %65 = arith.truncf %64 : vector<2x8x8xf32> to vector<2x8x8xbf16>
    %66 = vector.extract_strided_slice %25 {offsets = [0, 0, 48], sizes = [2, 8, 8], strides = [1, 1, 1]} : vector<2x8x96xf32> to vector<2x8x8xf32>
    %67 = arith.truncf %66 : vector<2x8x8xf32> to vector<2x8x8xbf16>
    %68 = vector.extract_strided_slice %25 {offsets = [0, 0, 80], sizes = [2, 8, 8], strides = [1, 1, 1]} : vector<2x8x96xf32> to vector<2x8x8xf32>
    %69 = arith.truncf %68 : vector<2x8x8xf32> to vector<2x8x8xbf16>
    "tpu.trace_start"() <{level = 10 : i32, message = "bqd,bkd->bqk"}> : () -> ()
    %cst_18 = arith.constant dense<0.000000e+00> : vector<2x8x8xf32>
    %70 = tpu.matmul %65, %67, %cst_18 {dimension_numbers = #tpu.dot_dimension_numbers<[2], [2], [1], [1], [0, 0, 0, 1, 1, 1], [0], [0]>} : vector<2x8x8xbf16>, vector<2x8x8xbf16>, vector<2x8x8xf32> -> vector<2x8x8xf32>
    "tpu.trace_stop"() : () -> ()
    %cst_19 = arith.constant dense<0xFF800000> : vector<2x8xf32>
    %71 = vector.multi_reduction <maximumf>, %70, %cst_19 [2] : vector<2x8x8xf32> to vector<2x8xf32>
    %72 = vector.shape_cast %71 : vector<2x8xf32> to vector<2x8x1xf32>
    %73 = vector.broadcast %72 : vector<2x8x1xf32> to vector<2x8x8xf32>
    %74 = arith.subf %70, %73 : vector<2x8x8xf32>
    %75 = math.exp %74 : vector<2x8x8xf32>
    %cst_20 = arith.constant dense<0.000000e+00> : vector<2x8xf32>
    %76 = vector.multi_reduction <add>, %75, %cst_20 [2] : vector<2x8x8xf32> to vector<2x8xf32>
    %77 = vector.shape_cast %76 : vector<2x8xf32> to vector<2x8x1xf32>
    %78 = arith.truncf %75 : vector<2x8x8xf32> to vector<2x8x8xbf16>
    "tpu.trace_start"() <{level = 10 : i32, message = "bqk,bkd->bqd"}> : () -> ()
    %cst_21 = arith.constant dense<0.000000e+00> : vector<2x8x8xf32>
    %79 = tpu.matmul %78, %69, %cst_21 {dimension_numbers = #tpu.dot_dimension_numbers<[2], [1], [1], [2], [0, 0, 0, 1, 1, 2], [0], [0]>} : vector<2x8x8xbf16>, vector<2x8x8xbf16>, vector<2x8x8xf32> -> vector<2x8x8xf32>
    "tpu.trace_stop"() : () -> ()
    %80 = tpu.reciprocal %77 {approx = true} : vector<2x8x1xf32> -> vector<2x8x1xf32>
    %81 = vector.broadcast %80 : vector<2x8x1xf32> to vector<2x8x8xf32>
    %82 = arith.mulf %79, %81 : vector<2x8x8xf32>
    %83 = vector.extract_strided_slice %25 {offsets = [0, 0, 24], sizes = [2, 8, 8], strides = [1, 1, 1]} : vector<2x8x96xf32> to vector<2x8x8xf32>
    %84 = arith.truncf %83 : vector<2x8x8xf32> to vector<2x8x8xbf16>
    %85 = vector.extract_strided_slice %25 {offsets = [0, 0, 56], sizes = [2, 8, 8], strides = [1, 1, 1]} : vector<2x8x96xf32> to vector<2x8x8xf32>
    %86 = arith.truncf %85 : vector<2x8x8xf32> to vector<2x8x8xbf16>
    %87 = vector.extract_strided_slice %25 {offsets = [0, 0, 88], sizes = [2, 8, 8], strides = [1, 1, 1]} : vector<2x8x96xf32> to vector<2x8x8xf32>
    %88 = arith.truncf %87 : vector<2x8x8xf32> to vector<2x8x8xbf16>
    "tpu.trace_start"() <{level = 10 : i32, message = "bqd,bkd->bqk"}> : () -> ()
    %cst_22 = arith.constant dense<0.000000e+00> : vector<2x8x8xf32>
    %89 = tpu.matmul %84, %86, %cst_22 {dimension_numbers = #tpu.dot_dimension_numbers<[2], [2], [1], [1], [0, 0, 0, 1, 1, 1], [0], [0]>} : vector<2x8x8xbf16>, vector<2x8x8xbf16>, vector<2x8x8xf32> -> vector<2x8x8xf32>
    "tpu.trace_stop"() : () -> ()
    %cst_23 = arith.constant dense<0xFF800000> : vector<2x8xf32>
    %90 = vector.multi_reduction <maximumf>, %89, %cst_23 [2] : vector<2x8x8xf32> to vector<2x8xf32>
    %91 = vector.shape_cast %90 : vector<2x8xf32> to vector<2x8x1xf32>
    %92 = vector.broadcast %91 : vector<2x8x1xf32> to vector<2x8x8xf32>
    %93 = arith.subf %89, %92 : vector<2x8x8xf32>
    %94 = math.exp %93 : vector<2x8x8xf32>
    %cst_24 = arith.constant dense<0.000000e+00> : vector<2x8xf32>
    %95 = vector.multi_reduction <add>, %94, %cst_24 [2] : vector<2x8x8xf32> to vector<2x8xf32>
    %96 = vector.shape_cast %95 : vector<2x8xf32> to vector<2x8x1xf32>
    %97 = arith.truncf %94 : vector<2x8x8xf32> to vector<2x8x8xbf16>
    "tpu.trace_start"() <{level = 10 : i32, message = "bqk,bkd->bqd"}> : () -> ()
    %cst_25 = arith.constant dense<0.000000e+00> : vector<2x8x8xf32>
    %98 = tpu.matmul %97, %88, %cst_25 {dimension_numbers = #tpu.dot_dimension_numbers<[2], [1], [1], [2], [0, 0, 0, 1, 1, 2], [0], [0]>} : vector<2x8x8xbf16>, vector<2x8x8xbf16>, vector<2x8x8xf32> -> vector<2x8x8xf32>
    "tpu.trace_stop"() : () -> ()
    %99 = tpu.reciprocal %96 {approx = true} : vector<2x8x1xf32> -> vector<2x8x1xf32>
    %100 = vector.broadcast %99 : vector<2x8x1xf32> to vector<2x8x8xf32>
    %101 = arith.mulf %98, %100 : vector<2x8x8xf32>
    %102 = tpu.concatenate %44, %63, %82, %101 in 2 : vector<2x8x8xf32>, vector<2x8x8xf32>, vector<2x8x8xf32>, vector<2x8x8xf32> -> vector<2x8x32xf32>
    %c0_26 = arith.constant 0 : index
    %c0_27 = arith.constant 0 : index
    %c0_28 = arith.constant 0 : index
    %103 = vector.load %arg4[%c0_26, %c0_27, %c0_28] : memref<2x8x32xf32, #tpu.memory_space<vmem>>, vector<2x8x32xf32>
    tpu.vector_store %arg4[%c0_26, %c0_27, %c0_28], %102 {strides = array<i32>} : memref<2x8x32xf32, #tpu.memory_space<vmem>>, vector<2x8x32xf32>,
    return
  }
  func.func @transform_0(%arg0: i32) -> (i32, i32) {
    %c0_i32 = arith.constant 0 : i32
    %c0_i32_0 = arith.constant 0 : i32
    return %arg0, %c0_i32 : i32, i32
  }
  func.func @transform_1(%arg0: i32) -> (i32, i32) {
    %c0_i32 = arith.constant 0 : i32
    %c0_i32_0 = arith.constant 0 : i32
    %c0_i32_1 = arith.constant 0 : i32
    return %c0_i32, %c0_i32_0 : i32, i32
  }
  func.func @transform_2(%arg0: i32) -> (i32, i32) {
    %c0_i32 = arith.constant 0 : i32
    %c0_i32_0 = arith.constant 0 : i32
    %c0_i32_1 = arith.constant 0 : i32
    return %c0_i32, %c0_i32_0 : i32, i32
  }
  func.func @transform_3(%arg0: i32) -> (i32, i32, i32) {
    %c0_i32 = arith.constant 0 : i32
    %c0_i32_0 = arith.constant 0 : i32
    %c0_i32_1 = arith.constant 0 : i32
    return %arg0, %c0_i32, %c0_i32_0 : i32, i32, i32
  }
}

</mosaic_0001>

<bundles_post_ra>
// kernel: tpu_custom_call.1
= control target key start
LH: loop header
LB: loop body
LE: loop exit
PB: predicated region body
PF: predicated region fallthrough
CT: control target
= control target key end

     0   :  { %8 = vsyncpa [#allocation3], 0  ;;  %s977_s0 = inlined_call_operand.hbm [shape: f32[16,32], index: 0, kind: input, shape index: {}]   ;;  %s978_s1 = inlined_call_operand.hbm [shape: bf16[32,96], index: 1, kind: input, shape index: {}]   ;;  %s979_s2 = inlined_call_operand.vmem [shape: f32[1,96], index: 2, kind: input, shape index: {}]   ;;  %s980_s3 = inlined_call_operand.hbm [shape: f32[2,8,32], index: 3, kind: output, shape index: {}]  }
   0x1   :  { %9 = vsyncpa [#allocation6], 0 }
   0x2   :  { %10 = vsyncpa [#allocation4], 0  ;;  %s15_s14 = sshll.u32 %s977_s0, 4  ;;  %s812_s15 = smov [#allocation2]   ;;  %s16_s14 = int_to_ptr.hbm [resolvable:$true] %s15_s14 }
   0x3   :  { %s17_s16 = sshll.u32 %s812_s15, 4  ;;  %s28_s19 = sshll.u32 %s978_s1, 4  ;;  %s18_s16 = int_to_ptr.vmem [resolvable:$true] %s17_s16  ;;  %s29_s19 = int_to_ptr.hbm [resolvable:$true] %s28_s19 }
   0x4   :  { %s813_s20 = smov 128   ;;  %s814_s21 = smov 8  }
   0x5   :  { %23 = dma.hbm_to_vmem [thread:$0]  %s16_s14, 256, %s18_s16, [#allocation3], %s813_s20, %s813_s20, %s814_s21  }
   0x6   :  { %s815_s22 = smov [#allocation5]   ;;  %s816_s24 = smov 64  }
   0x7   :  { %s30_s23 = sshll.u32 %s815_s22, 4  ;;  %s817_s0 = smov 4   ;;  %s31_s23 = int_to_ptr.vmem [resolvable:$true] %s30_s23 }
   0x8   :  { %36 = dma.hbm_to_vmem [thread:$0]  %s29_s19, 256, %s31_s23, [#allocation6], %s816_s24, %s816_s24, %s817_s0  }
   0x9   :  { %806 = dma.done.wait [#allocation3], 256  }
   0xa   :  { %807 = vsyncadd [#allocation3], 4294967040 }
   0xb   :  { %808 = dma.done.wait [#allocation6], 256  }
   0xc   :  { %809 = vsyncadd [#allocation6], 4294967040  ;;  %vm50_vm0 = vcmask 261120   ;;  %v48_v0 = vld [vmem:[#allocation2] sm:$0xff]  ;;  %v49_v2 = vld [vmem:[#allocation2 + $0x8] sm:$0xff]  ;;  %v818_v4 = vmov 32.0  }
   0xd   :  { %v51_v1 = vsel %vm50_vm0, %v48_v0, 0.0  ;;  %v54_v3 = vsel %vm50_vm0, %v49_v2, 0.0  ;;  %696 = vrcp.f32 %v818_v4  ;;  %v674_v21 = vld [vmem:[#allocation5 + $0x8] sm:$0xff]  ;;  %v673_v22 = vld [vmem:[#allocation5] sm:$0xff]  ;;  %v695_v46 = vld [vmem:[%s979_s2] ss:$0 sm:$0xff] }
   0xe   :  { %52 = vadd.xlane.f32.xlu0 %v51_v1  ;;  %132 = vmatpush.bf16.msra.mxu0 %v674_v21  ;;  %s819_s26 = smov 88   ;;  %s820_s27 = smov 96   ;;  %vm147_vm8 = vcmask 64512   ;;  %vm216_vm9 = vcmask 1043456   ;;  %vm620_vm10 = vcmask 130048   ;;  %vm623_vm11 = vcmask 195584  }
   0xf   :  { %s821_s2 = smov 80   ;;  %s822_s28 = smov 112  }
  0x10   :  { %s823_s29 = smov 72   ;;  %s824_s30 = smov 120  }
  0x11   :  { %s825_s4 = smov 104   ;;  %s826_s5 = smov 56  }
  0x12   :  { %133 = vmatpush.bf16.msra.mxu0 %v673_v22  ;;  %s827_s6 = smov 48   ;;  %s828_s7 = smov 40  }
  0x13   :  { %v697_v5 = vpop.eup %696  ;;  %s829_s8 = smov 16   ;;  %s830_s9 = smov 24  }
  0x14   :  { %v58_v6 = vmul.f32 32.0, %v697_v5  ;;  %vm62_vm1 = vweird.f32 %v697_v5  ;;  %s831_s10 = smov [#allocation7]   ;;  %s634_s14 = sshll.u32 %s980_s3, 4  ;;  %s635_s14 = int_to_ptr.hbm [resolvable:$true] %s634_s14 }
  0x15   :  { %s632_s11 = sshll.u32 %s831_s10, 4  ;;  %s633_s11 = int_to_ptr.vmem [resolvable:$true] %s632_s11 }
  0x16   :  { %55 = vadd.xlane.f32.xlu0 %v54_v3  ;;  %v59_v7 = vsub.f32 1.0, %v58_v6 }
  0x18   :  { %v60_v8 = vmul.f32 %v697_v5, %v59_v7 }
  0x1a   :  { %v61_v9 = vadd.f32 %v697_v5, %v60_v8 }
  0x1c   :  { %v63_v10 = vsel %vm62_vm1, %v697_v5, %v61_v9 }
  0x81   :  { %v53_v11 = vpop.xlane.xlu0 %52 }
  0x82   :  { %v64_v12 = vmul.f32 %v63_v10, %v53_v11 }
  0x84   :  { %v66_v13 = vsub.f32 %v48_v0, %v64_v12 }
  0x86   :  { %v68_v14 = vmul.f32 %v66_v13, %v66_v13 }
  0x88   :  { %v70_v15 = vsel %vm50_vm0, %v68_v14, 0.0 }
  0x89   :  { %71 = vadd.xlane.f32.xlu1 %v70_v15  ;;  %v56_v16 = vpop.xlane.xlu0 %55 }
  0x8a   :  { %v65_v17 = vmul.f32 %v63_v10, %v56_v16 }
  0x8c   :  { %v67_v18 = vsub.f32 %v49_v2, %v65_v17 }
  0x8e   :  { %v69_v19 = vmul.f32 %v67_v18, %v67_v18 }
  0x90   :  { %v73_v20 = vsel %vm50_vm0, %v69_v19, 0.0 }
  0x91   :  { %74 = vadd.xlane.f32.xlu1 %v73_v20 }
  0xfc   :  { %v72_v23 = vpop.xlane.xlu1 %71 }
  0xfd   :  { %v76_v24 = vmul.f32 %v72_v23, %v63_v10 }
  0xff   :  { %v78_v25 = vadd.f32 1e-05, %v76_v24 }
 0x101   :  { %698 = vrsqrt.f32 %v78_v25  ;;  %vm86_vm3 = vweird.f32 %v78_v25 }
 0x104   :  { %v75_v26 = vpop.xlane.xlu1 %74 }
 0x105   :  { %v77_v27 = vmul.f32 %v75_v26, %v63_v10 }
 0x107   :  { %v699_v28 = vpop.eup %698  ;;  %v79_v29 = vadd.f32 1e-05, %v77_v27 }
 0x108   :  { %v81_v30 = vmul.f32 %v699_v28, %v78_v25  ;;  %vm87_vm2 = vweird.f32 %v699_v28 }
 0x109   :  { %700 = vrsqrt.f32 %v79_v29  ;;  %vm88_vm5 = vmor %vm86_vm3, %vm87_vm2  ;;  %vm96_vm6 = vweird.f32 %v79_v29 }
 0x10a   :  { %v82_v31 = vmul.f32 %v699_v28, %v81_v30 }
 0x10c   :  { %v83_v32 = vmul.f32 0.5, %v82_v31 }
 0x10e   :  { %v84_v34 = vsub.f32 1.5, %v83_v32 }
 0x10f   :  { %v701_v33 = vpop.eup %700 }
 0x110   :  { %v91_v35 = vmul.f32 %v701_v33, %v79_v29  ;;  %v85_v37 = vmul.f32 %v699_v28, %v84_v34  ;;  %vm97_vm4 = vweird.f32 %v701_v33 }
 0x111   :  { %vm98_vm7 = vmor %vm96_vm6, %vm97_vm4 }
 0x112   :  { %v92_v36 = vmul.f32 %v701_v33, %v91_v35  ;;  %v89_v41 = vsel %vm88_vm5, %v699_v28, %v85_v37 }
 0x113   :  { %v100_v43 = vmul.f32 %v89_v41, %v66_v13 }
 0x114   :  { %v93_v38 = vmul.f32 0.5, %v92_v36 }
 0x116   :  { %v94_v39 = vsub.f32 1.5, %v93_v38 }
 0x118   :  { %v95_v40 = vmul.f32 %v701_v33, %v94_v39 }
 0x11a   :  { %v99_v42 = vsel %vm98_vm7, %v701_v33, %v95_v40 }
 0x11b   :  { %v101_v44 = vmul.f32 %v99_v42, %v67_v18 }
 0x11d   :  { %v102_v45 = vpack.c.bf16 %v101_v44, %v100_v43 }
 0x11f   :  { %656 = vmatmul.msk.bf16.vlgmr.msra.gmra.mxu0 %vm50_vm0, %v102_v45 }
 0x19c   :  { %v135_v47 = vpop.f32.mrf.mxu0 }
 0x19d   :  { %v136_v48 = vadd.f32 %v695_v46, %v135_v47 }
 0x19f   :  { %v140_v49 = vpack.c.bf16 %v136_v48, %v136_v48 }
 0x1a1   :  { %v143_v50 = vunpack.c.l.b16 %v140_v49 }
 0x1a3   :  { %v871_v51 = vpack.c.b16 %v143_v50, %v143_v50 }
 0x1a4   :  { %v137_v52 = vpop.f32.mrf.mxu0 }
 0x1a5   :  { %v138_v53 = vadd.f32 %v695_v46, %v137_v52  ;;  %260 = vrot.lane.b32.xlu0 %v871_v51, %s819_s26  ;;  %145 = vrot.lane.b32.xlu2 %v871_v51, %s820_s27 }
 0x1a7   :  { %v141_v54 = vpack.c.bf16 %v138_v53, %v138_v53 }
 0x1a9   :  { %v168_v55 = vunpack.c.l.b16 %v141_v54 }
 0x1ab   :  { %v875_v56 = vpack.c.b16 %v168_v55, %v168_v55 }
 0x1ad   :  { %283 = vrot.lane.b32.xlu1 %v875_v56, %s819_s26  ;;  %395 = vrot.lane.b32.xlu0 %v875_v56, %s821_s2 }
 0x1ae   :  { %170 = vrot.lane.b32.xlu2 %v875_v56, %s820_s27 }
 0x1b5   :  { %393 = vrot.lane.b32.xlu1 %v875_v56, %s822_s28  ;;  %484 = vrot.lane.b32.xlu0 %v871_v51, %s823_s29 }
 0x1b6   :  { %258 = vrot.lane.b32.xlu2 %v871_v51, %s824_s30 }
 0x1bd   :  { %482 = vrot.lane.b32.xlu1 %v871_v51, %s825_s4  ;;  %505 = vrot.lane.b32.xlu0 %v875_v56, %s825_s4 }
 0x1be   :  { %372 = vrot.lane.b32.xlu2 %v871_v51, %s821_s2 }
 0x1c5   :  { %211 = vrot.lane.b32.xlu1 %v871_v51, %s816_s24 }
 0x1c6   :  { %281 = vrot.lane.b32.xlu2 %v875_v56, %s824_s30 }
 0x1cd   :  { %233 = vrot.lane.b32.xlu1 %v875_v56, %s816_s24 }
 0x1ce   :  { %370 = vrot.lane.b32.xlu2 %v871_v51, %s822_s28 }
 0x1d6   :  { %507 = vrot.lane.b32.xlu2 %v875_v56, %s823_s29 }
 0x1ff   :  { %v146_v57 = vpop.permute.xlu2 %145 }
 0x200   :  { %v152_v58 = vsel %vm147_vm8, %v146_v57, 0 }
 0x201   :  { %161 = vmatpush.bf16.xpose.msra.mxu1 %v152_v58 }
 0x208   :  { %v171_v59 = vpop.permute.xlu2 %170  ;;  %657 = vmatmul.msk.bf16.vlgmr.msra.gmra.mxu1 %vm147_vm8, %v140_v49 }
 0x209   :  { %v176_v60 = vsel %vm147_vm8, %v171_v59, 0 }
 0x20a   :  { %185 = vmatpush.bf16.xpose.msra.mxu2 %v176_v60 }
 0x210   :  { %v259_v61 = vpop.permute.xlu2 %258 }
 0x211   :  { %658 = vmatmul.msk.bf16.vlgmr.msra.gmra.mxu2 %vm147_vm8, %v141_v54 }
 0x217   :  { %v261_v62 = vpop.permute.xlu0 %260 }
 0x218   :  { %v373_v63 = vpop.permute.xlu2 %372  ;;  %v266_v0 = vsel %vm147_vm8, %v261_v62, 0 }
 0x219   :  { %v378_v1 = vsel %vm147_vm8, %v373_v63, 0  ;;  %275 = vmatpush.bf16.xpose.msrb.mxu0 %v266_v0 }
 0x21f   :  { %v284_v2 = vpop.permute.xlu1 %283  ;;  %v396_v3 = vpop.permute.xlu0 %395 }
 0x220   :  { %v401_v4 = vsel %vm147_vm8, %v396_v3, 0  ;;  %v282_v5 = vpop.permute.xlu2 %281  ;;  %661 = vmatmul.msk.bf16.vlgmr.msrb.gmra.mxu0 %vm147_vm8, %v259_v61  ;;  %v289_v6 = vsel %vm147_vm8, %v284_v2, 0 }
 0x221   :  { %387 = vmatpush.bf16.xpose.msra.mxu0 %v378_v1  ;;  %298 = vmatpush.bf16.xpose.msrb.mxu1 %v289_v6 }
 0x227   :  { %v394_v7 = vpop.permute.xlu1 %393  ;;  %v485_v8 = vpop.permute.xlu0 %484 }
 0x228   :  { %v490_v9 = vsel %vm147_vm8, %v485_v8, 0  ;;  %v371_v10 = vpop.permute.xlu2 %370  ;;  %662 = vmatmul.msk.bf16.vlgmr.msrb.gmra.mxu1 %vm147_vm8, %v282_v5 }
 0x229   :  { %410 = vmatpush.bf16.xpose.msra.mxu1 %v401_v4  ;;  %499 = vmatpush.bf16.xpose.msrb.mxu0 %v490_v9 }
 0x22f   :  { %v483_v11 = vpop.permute.xlu1 %482  ;;  %v506_v18 = vpop.permute.xlu0 %505 }
 0x230   :  { %v508_v12 = vpop.permute.xlu2 %507  ;;  %665 = vmatmul.msk.bf16.vlgmr.msra.gmra.mxu0 %vm147_vm8, %v371_v10 }
 0x231   :  { %v513_v13 = vsel %vm147_vm8, %v508_v12, 0 }
 0x232   :  { %522 = vmatpush.bf16.xpose.msrb.mxu1 %v513_v13 }
 0x237   :  { %v212_v14 = vpop.permute.xlu1 %211 }
 0x238   :  { %666 = vmatmul.msk.bf16.vlgmr.msra.gmra.mxu1 %vm147_vm8, %v394_v7  ;;  %v218_v15 = vsel %vm216_vm9, %v212_v14, 0 }
 0x239   :  { %227 = vmatpush.bf16.msra.mxu3 %v218_v15 }
 0x23f   :  { %v234_v16 = vpop.permute.xlu1 %233 }
 0x240   :  { %669 = vmatmul.msk.bf16.vlgmr.msrb.gmra.mxu0 %vm147_vm8, %v483_v11  ;;  %v239_v17 = vsel %vm216_vm9, %v234_v16, 0 }
 0x241   :  { %248 = vmatpush.bf16.msrb.mxu3 %v239_v17 }
 0x248   :  { %670 = vmatmul.msk.bf16.vlgmr.msrb.gmra.mxu1 %vm147_vm8, %v506_v18 }
 0x285   :  { %v163_v19 = vpop.f32.mrf.mxu1 }
 0x286   :  { %v191_v20 = vsel %vm147_vm8, %v163_v19, -inf }
 0x287   :  { %192 = vmax.xlane.f32.xlu2 %v191_v20 }
 0x28d   :  { %v165_v21 = vpop.f32.mrf.mxu1 }
 0x294   :  { %v187_v22 = vpop.f32.mrf.mxu2 }
 0x295   :  { %v194_v23 = vsel %vm147_vm8, %v187_v22, -inf }
 0x296   :  { %195 = vmax.xlane.f32.xlu0 %v194_v23 }
 0x29c   :  { %v189_v24 = vpop.f32.mrf.mxu2 }
 0x29d   :  { %v277_v25 = vpop.f32.mrf.mxu0 }
 0x29e   :  { %v304_v26 = vsel %vm147_vm8, %v277_v25, -inf }
 0x29f   :  { %345 = vrot.lane.b32.xlu2 %v875_v56, %s826_s5  ;;  %305 = vmax.xlane.f32.xlu1 %v304_v26 }
 0x2a5   :  { %v279_v27 = vpop.f32.mrf.mxu0  ;;  %v915_v28 = vpop.f32.mrf.mxu1 }
 0x2a6   :  { %v307_v38 = vsel %vm147_vm8, %v915_v28, -inf }
 0x2aa   :  { %324 = vrot.lane.b32.xlu0 %v871_v51, %s826_s5 }
 0x2ad   :  { %v302_v29 = vpop.f32.mrf.mxu1  ;;  %v389_v30 = vpop.f32.mrf.mxu0 }
 0x2ae   :  { %v416_v31 = vsel %vm147_vm8, %v389_v30, -inf }
 0x2af   :  { %417 = vmax.xlane.f32.xlu1 %v416_v31 }
 0x2b5   :  { %v391_v32 = vpop.f32.mrf.mxu0  ;;  %v919_v33 = vpop.f32.mrf.mxu1 }
 0x2b6   :  { %v419_v40 = vsel %vm147_vm8, %v919_v33, -inf }
 0x2bd   :  { %v414_v34 = vpop.f32.mrf.mxu1  ;;  %v921_v35 = vpop.f32.mrf.mxu0 }
 0x2be   :  { %v528_v49 = vsel %vm147_vm8, %v921_v35, -inf }
 0x2c5   :  { %v503_v36 = vpop.f32.mrf.mxu0  ;;  %v923_v37 = vpop.f32.mrf.mxu1 }
 0x2c6   :  { %v531_v41 = vsel %vm147_vm8, %v923_v37, -inf }
 0x2c8   :  { %308 = vmax.xlane.f32.xlu2 %v307_v38  ;;  %436 = vrot.lane.b32.xlu1 %v871_v51, %s827_s6 }
 0x2cd   :  { %v526_v39 = vpop.f32.mrf.mxu1 }
 0x2d4   :  { %420 = vmax.xlane.f32.xlu0 %v419_v40 }
 0x2e0   :  { %457 = vrot.lane.b32.xlu2 %v875_v56, %s827_s6 }
 0x2e8   :  { %548 = vrot.lane.b32.xlu0 %v871_v51, %s828_s7 }
 0x2f2   :  { %532 = vmax.xlane.f32.xlu1 %v531_v41 }
 0x2fa   :  { %v193_v42 = vpop.xlane.xlu2 %192 }
 0x2fb   :  { %v197_v43 = vsub.f32 %v163_v19, %v193_v42 }
 0x2fd   :  { %v199_v44 = vmul.f32 1.442695, %v197_v43 }
 0x2ff   :  { %702 = vpow2.f32 %v199_v44 }
 0x302   :  { %v346_v46 = vpop.permute.xlu2 %345 }
 0x303   :  { %v351_v48 = vsel %vm216_vm9, %v346_v46, 0 }
 0x305   :  { %v703_v45 = vpop.eup %702 }
 0x306   :  { %v209_v47 = vpack.c.bf16 %v703_v45, %v703_v45 }
 0x308   :  { %659 = vmatmul.msk.bf16.vlgmr.msra.gmra.mxu3 %vm147_vm8, %v209_v47 }
 0x309   :  { %v196_v50 = vpop.xlane.xlu0 %195  ;;  %360 = vmatpush.bf16.msra.mxu3 %v351_v48  ;;  %529 = vmax.xlane.f32.xlu2 %v528_v49 }
 0x30a   :  { %v198_v51 = vsub.f32 %v187_v22, %v196_v50  ;;  %v203_v22 = vsel %vm147_vm8, %v703_v45, 0.0 }
 0x30c   :  { %v201_v52 = vmul.f32 1.442695, %v198_v51 }
 0x30e   :  { %704 = vpow2.f32 %v201_v52 }
 0x312   :  { %v306_v53 = vpop.xlane.xlu1 %305 }
 0x313   :  { %v310_v54 = vsub.f32 %v277_v25, %v306_v53 }
 0x314   :  { %v705_v55 = vpop.eup %704 }
 0x315   :  { %v312_v57 = vmul.f32 1.442695, %v310_v54  ;;  %v210_v58 = vpack.c.bf16 %v705_v55, %v705_v55  ;;  %v206_v0 = vsel %vm147_vm8, %v705_v55, 0.0 }
 0x317   :  { %706 = vpow2.f32 %v312_v57 }
 0x318   :  { %660 = vmatmul.msk.bf16.vlgmr.msrb.gmra.mxu3 %vm147_vm8, %v210_v58 }
 0x31c   :  { %v325_v59 = vpop.permute.xlu0 %324 }
 0x31d   :  { %v707_v60 = vpop.eup %706  ;;  %v330_v61 = vsel %vm216_vm9, %v325_v59, 0 }
 0x31e   :  { %339 = vmatpush.bf16.msrb.mxu2 %v330_v61  ;;  %v316_v62 = vsel %vm147_vm8, %v707_v60, 0.0  ;;  %v322_v63 = vpack.c.bf16 %v707_v60, %v707_v60 }
 0x31f   :  { %317 = vadd.xlane.f32.xlu0 %v316_v62 }
 0x321   :  { %663 = vmatmul.msk.bf16.vlgmr.msrb.gmra.mxu2 %vm147_vm8, %v322_v63  ;;  %569 = vrot.lane.b32.xlu2 %v875_v56, %s828_s7 }
 0x322   :  { %v418_v1 = vpop.xlane.xlu1 %417 }
 0x323   :  { %v422_v2 = vsub.f32 %v389_v30, %v418_v1 }
 0x325   :  { %v424_v3 = vmul.f32 1.442695, %v422_v2 }
 0x327   :  { %207 = vadd.xlane.f32.xlu0 %v206_v0  ;;  %708 = vpow2.f32 %v424_v3 }
 0x32d   :  { %v709_v4 = vpop.eup %708 }
 0x32e   :  { %v434_v9 = vpack.c.bf16 %v709_v4, %v709_v4  ;;  %v428_v18 = vsel %vm147_vm8, %v709_v4, 0.0 }
 0x33a   :  { %v437_v5 = vpop.permute.xlu1 %436 }
 0x33b   :  { %v442_v6 = vsel %vm216_vm9, %v437_v5, 0  ;;  %v309_v7 = vpop.xlane.xlu2 %308 }
 0x33c   :  { %v311_v8 = vsub.f32 %v915_v28, %v309_v7  ;;  %451 = vmatpush.bf16.msra.mxu2 %v442_v6 }
 0x33e   :  { %v314_v10 = vmul.f32 1.442695, %v311_v8 }
 0x33f   :  { %667 = vmatmul.msk.bf16.vlgmr.msra.gmra.mxu2 %vm147_vm8, %v434_v9 }
 0x340   :  { %710 = vpow2.f32 %v314_v10 }
 0x343   :  { %v458_v56 = vpop.permute.xlu2 %457 }
 0x344   :  { %v463_v11 = vsel %vm216_vm9, %v458_v56, 0 }
 0x345   :  { %472 = vmatpush.bf16.msrb.mxu3 %v463_v11 }
 0x346   :  { %v711_v12 = vpop.eup %710 }
 0x347   :  { %v323_v13 = vpack.c.bf16 %v711_v12, %v711_v12  ;;  %v421_v14 = vpop.xlane.xlu0 %420  ;;  %v319_v15 = vsel %vm147_vm8, %v711_v12, 0.0 }
 0x348   :  { %v423_v16 = vsub.f32 %v919_v33, %v421_v14  ;;  %320 = vadd.xlane.f32.xlu1 %v319_v15 }
 0x349   :  { %664 = vmatmul.msk.bf16.vlgmr.msra.gmra.mxu3 %vm147_vm8, %v323_v13 }
 0x34a   :  { %v426_v17 = vmul.f32 1.442695, %v423_v16 }
 0x34c   :  { %712 = vpow2.f32 %v426_v17 }
 0x350   :  { %429 = vadd.xlane.f32.xlu1 %v428_v18 }
 0x352   :  { %v713_v19 = vpop.eup %712 }
 0x353   :  { %v431_v20 = vsel %vm147_vm8, %v713_v19, 0.0  ;;  %v435_v21 = vpack.c.bf16 %v713_v19, %v713_v19 }
 0x354   :  { %432 = vadd.xlane.f32.xlu2 %v431_v20 }
 0x358   :  { %204 = vadd.xlane.f32.xlu1 %v203_v22 }
 0x359   :  { %668 = vmatmul.msk.bf16.vlgmr.msrb.gmra.mxu3 %vm147_vm8, %v435_v21 }
 0x35a   :  { %v549_v23 = vpop.permute.xlu0 %548 }
 0x35b   :  { %v554_v24 = vsel %vm216_vm9, %v549_v23, 0 }
 0x35c   :  { %563 = vmatpush.bf16.msrb.mxu2 %v554_v24 }
 0x365   :  { %v533_v25 = vpop.xlane.xlu1 %532 }
 0x366   :  { %v535_v26 = vsub.f32 %v923_v37, %v533_v25 }
 0x368   :  { %v538_v27 = vmul.f32 1.442695, %v535_v26 }
 0x36a   :  { %714 = vpow2.f32 %v538_v27 }
 0x370   :  { %v715_v31 = vpop.eup %714 }
 0x371   :  { %v547_v36 = vpack.c.bf16 %v715_v31, %v715_v31 }
 0x37c   :  { %v530_v28 = vpop.xlane.xlu2 %529 }
 0x37d   :  { %v534_v29 = vsub.f32 %v921_v35, %v530_v28  ;;  %v543_v35 = vsel %vm147_vm8, %v715_v31, 0.0 }
 0x37f   :  { %v536_v30 = vmul.f32 1.442695, %v534_v29 }
 0x381   :  { %716 = vpow2.f32 %v536_v30 }
 0x384   :  { %v570_v32 = vpop.permute.xlu2 %569 }
 0x385   :  { %v575_v33 = vsel %vm216_vm9, %v570_v32, 0 }
 0x386   :  { %584 = vmatpush.bf16.msra.mxu3 %v575_v33 }
 0x387   :  { %v717_v34 = vpop.eup %716 }
 0x388   :  { %v546_v38 = vpack.c.bf16 %v717_v34, %v717_v34  ;;  %v540_v39 = vsel %vm147_vm8, %v717_v34, 0.0 }
 0x389   :  { %541 = vadd.xlane.f32.xlu1 %v540_v39  ;;  %672 = vmatmul.msk.bf16.vlgmr.msra.gmra.mxu3 %vm147_vm8, %v547_v36 }
 0x38a   :  { %671 = vmatmul.msk.bf16.vlgmr.msrb.gmra.mxu2 %vm147_vm8, %v546_v38 }
 0x38b   :  { %v229_v37 = vpop.f32.mrf.mxu3 }
 0x391   :  { %544 = vadd.xlane.f32.xlu1 %v543_v35 }
 0x392   :  { %v318_v42 = vpop.xlane.xlu0 %317 }
 0x393   :  { %v231_v40 = vpop.f32.mrf.mxu3  ;;  %718 = vrcp.f32 %v318_v42 }
 0x399   :  { %v719_v45 = vpop.eup %718 }
 0x39a   :  { %v208_v12 = vpop.xlane.xlu0 %207 }
 0x39b   :  { %v250_v41 = vpop.f32.mrf.mxu3 }
 0x3a3   :  { %v252_v43 = vpop.f32.mrf.mxu3 }
 0x3a4   :  { %v341_v44 = vpop.f32.mrf.mxu2 }
 0x3a5   :  { %v368_v46 = vmul.f32 %v719_v45, %v341_v44 }
 0x3aa   :  { %596 = vrot.lane.b32.xlu1 %v368_v46, %s814_s21 }
 0x3ac   :  { %v343_v47 = vpop.f32.mrf.mxu2 }
 0x3bb   :  { %v321_v48 = vpop.xlane.xlu1 %320 }
 0x3c2   :  { %v453_v49 = vpop.f32.mrf.mxu2 }
 0x3c3   :  { %v430_v50 = vpop.xlane.xlu1 %429 }
 0x3c4   :  { %720 = vrcp.f32 %v430_v50 }
 0x3c5   :  { %722 = vrcp.f32 %v321_v48 }
 0x3c7   :  { %v433_v60 = vpop.xlane.xlu2 %432 }
 0x3ca   :  { %v721_v51 = vpop.eup %720  ;;  %v455_v52 = vpop.f32.mrf.mxu2 }
 0x3cb   :  { %v205_v53 = vpop.xlane.xlu1 %204  ;;  %v480_v54 = vmul.f32 %v721_v51, %v453_v49  ;;  %v723_v55 = vpop.eup %722 }
 0x3cc   :  { %724 = vrcp.f32 %v205_v53  ;;  %v362_v57 = vpop.f32.mrf.mxu3 }
 0x3cd   :  { %v369_v58 = vmul.f32 %v723_v55, %v362_v57  ;;  %604 = vrot.lane.b32.xlu2 %v480_v54, %s829_s8  ;;  %726 = vrcp.f32 %v433_v60 }
 0x3cf   :  { %598 = vrot.lane.b32.xlu0 %v369_v58, %s814_s21 }
 0x3d2   :  { %v725_v59 = vpop.eup %724 }
 0x3d3   :  { %v256_v61 = vmul.f32 %v725_v59, %v229_v37  ;;  %v727_v63 = vpop.eup %726 }
 0x3d4   :  { %v364_v62 = vpop.f32.mrf.mxu3 }
 0x3dc   :  { %v474_v0 = vpop.f32.mrf.mxu3 }
 0x3dd   :  { %v481_v1 = vmul.f32 %v727_v63, %v474_v0 }
 0x3df   :  { %606 = vrot.lane.b32.xlu0 %v481_v1, %s829_s8 }
 0x3e4   :  { %v476_v2 = vpop.f32.mrf.mxu3 }
 0x3fc   :  { %v542_v3 = vpop.xlane.xlu1 %541 }
 0x404   :  { %v545_v4 = vpop.xlane.xlu1 %544 }
 0x405   :  { %728 = vrcp.f32 %v545_v4 }
 0x406   :  { %730 = vrcp.f32 %v542_v3 }
 0x407   :  { %732 = vrcp.f32 %v208_v12 }
 0x40b   :  { %v729_v5 = vpop.eup %728 }
 0x40c   :  { %v586_v6 = vpop.f32.mrf.mxu3  ;;  %v731_v7 = vpop.eup %730 }
 0x40d   :  { %v593_v8 = vmul.f32 %v729_v5, %v586_v6  ;;  %v565_v9 = vpop.f32.mrf.mxu2  ;;  %v733_v16 = vpop.eup %732 }
 0x40e   :  { %v592_v10 = vmul.f32 %v731_v7, %v565_v9  ;;  %v257_v17 = vmul.f32 %v733_v16, %v250_v41 }
 0x40f   :  { %614 = vrot.lane.b32.xlu0 %v593_v8, %s830_s9 }
 0x410   :  { %612 = vrot.lane.b32.xlu1 %v592_v10, %s830_s9 }
 0x414   :  { %v588_v56 = vpop.f32.mrf.mxu3 }
 0x415   :  { %v567_v11 = vpop.f32.mrf.mxu2 }
 0x41c   :  { %v597_v15 = vpop.permute.xlu1 %596 }
 0x41d   :  { %v618_v20 = vsel %vm147_vm8, %v256_v61, %v597_v15 }
 0x427   :  { %v605_v18 = vpop.permute.xlu2 %604 }
 0x428   :  { %v621_v23 = vsel %vm620_vm10, %v618_v20, %v605_v18 }
 0x441   :  { %v599_v13 = vpop.permute.xlu0 %598 }
 0x442   :  { %v619_v19 = vsel %vm147_vm8, %v257_v17, %v599_v13 }
 0x451   :  { %v607_v14 = vpop.permute.xlu0 %606 }
 0x452   :  { %v622_v21 = vsel %vm620_vm10, %v619_v19, %v607_v14 }
 0x481   :  { %v615_v22 = vpop.permute.xlu0 %614 }
 0x482   :  { %v625_v24 = vsel %vm623_vm11, %v622_v21, %v615_v22  ;;  %v613_v25 = vpop.permute.xlu1 %612 }
 0x483   :  { %627 = vst.msk [vmem:[#allocation7 + $0x8] sm:$0xff] %vm50_vm0, %v625_v24  ;;  %v624_v26 = vsel %vm623_vm11, %v621_v23, %v613_v25 }
 0x484   :  { %626 = vst.msk [vmem:[#allocation7] sm:$0xff] %vm50_vm0, %v624_v26 }
 0x485   :  { %640 = dma.vmem_to_hbm [thread:$0]  %s633_s11, 256, %s635_s14, [#allocation4], %s813_s20, %s813_s20, %s814_s21  }
 0x486   :  { %810 = dma.done.wait [#allocation4], 256  }
 0x487   :  { %811 = vsyncadd [#allocation4], 4294967040 }
 0x488   :  { %645 = vsyncpa [#allocation3], 1 }
 0x489   :  { %646 = vsyncpa [#allocation6], 1 }
 0x48a   :  { %647 = vsyncpa [#allocation4], 1 }

</bundles_post_ra>
